<compile_context>
chip_gen: v7x
topology: tpu7x:2x2x1
jax: 0.10.0
libtpu: 0.0.40
codegen_flags: <defaults>
</compile_context>

<pallas_src>
import functools

import jax
import jax.numpy as jnp
from jax.experimental import pallas as pl
from jax.experimental.pallas import tpu as pltpu

HIDDEN = 256          # hidden width of the MLP
MAX_TILE_B = 512      # upper bound on the batch tile (amortizes grid-step cost)


def dqn_kernel(x_ref, w1_ref, b1_ref, w2_ref, b2_ref, w3_ref, b3_ref,
               q_ref, act_ref):
    # ---- Layer 1: (TILE_B, n_in) @ (n_in, 256) + b1 -> ReLU -------------
    # x arrives as bf16 (cast once in the wrapper); K = n_in (4) — the MXU
    # pads tiny contractions internally, no lane padding needed on our side.
    h1 = jnp.dot(x_ref[...], w1_ref[...], preferred_element_type=jnp.float32)
    h1 = jnp.maximum(h1 + b1_ref[...], 0.0)            # f32 epilogue (v5e-safe)

    # ---- Layer 2: (TILE_B, 256) @ (256, 256) + b2 -> ReLU ---------------
    h2 = jnp.dot(h1.astype(jnp.bfloat16), w2_ref[...],
                 preferred_element_type=jnp.float32)
    h2 = jnp.maximum(h2 + b2_ref[...], 0.0)

    # ---- Output layer: (TILE_B, 256) @ (256, n_actions) + b3 ------------
    q = jnp.dot(h2.astype(jnp.bfloat16), w3_ref[...],
                preferred_element_type=jnp.float32) + b3_ref[...]
    q_ref[...] = q                                      # narrow, f32 store

    # ---- Fused greedy-action selection (first-index tie-break) ----------
    col = jax.lax.broadcasted_iota(jnp.int32, q.shape, 1)
    q_max = jnp.max(q, axis=-1, keepdims=True)
    idx = jnp.where(q == q_max, col, jnp.int32(q.shape[-1]))
    act_ref[...] = jnp.min(idx, axis=-1, keepdims=True)


def init_params(key, n_inputs, n_actions, hidden=HIDDEN):
    # Deterministic init mimicking PyTorch Linear default (uniform +-1/sqrt(fan_in)).
    ks = jax.random.split(key, 6)

    def lin(kw, kb, fan_in, fan_out):
        bound = 1.0 / jnp.sqrt(jnp.float32(fan_in))
        w = jax.random.uniform(kw, (fan_in, fan_out), jnp.float32, -bound, bound)
        b = jax.random.uniform(kb, (1, fan_out), jnp.float32, -bound, bound)
        return w, b

    w1, b1 = lin(ks[0], ks[1], n_inputs, hidden)
    w2, b2 = lin(ks[2], ks[3], hidden, hidden)
    w3, b3 = lin(ks[4], ks[5], hidden, n_actions)
    return (w1, b1, w2, b2, w3, b3)


def pack_params(params):
    """One-time prep: weights -> bf16 (native MXU input, halves HBM->VMEM DMA).

    No lane padding any more: n_inputs / n_actions stay at their real widths and
    are handled as full-extent block dims. Biases stay f32 (VPU epilogue).
    """
    w1, b1, w2, b2, w3, b3 = params
    return (w1.astype(jnp.bfloat16), b1,
            w2.astype(jnp.bfloat16), b2,
            w3.astype(jnp.bfloat16), b3)


def _pick_tile_b(batch):
    """Batch-tile heuristic.

    Big tiles amortize the ~0.35 us/grid-step overhead; cap at MAX_TILE_B to
    bound VMEM, keep >= 2 tiles when the batch allows (v7x has 2 TensorCores
    and the 'parallel' batch axis is what shards across them), and keep tiles
    a multiple of 128 rows for full MXU M-fill.
    """
    if batch <= 128:
        return 128
    if batch >= 2 * MAX_TILE_B:
        return MAX_TILE_B
    half = pl.cdiv(batch, 2)
    return min(MAX_TILE_B, pl.cdiv(half, 128) * 128)


@jax.jit
def dqn_forward(x, packed):
    """Returns (q_values[batch, n_actions], greedy_actions[batch])."""
    w1, b1, w2, b2, w3, b3 = packed
    batch, n_in = x.shape
    n_act = w3.shape[1]

    tile_b = _pick_tile_b(batch)
    n_tiles = pl.cdiv(batch, tile_b)
    b_pad = n_tiles * tile_b

    # bf16 at the MXU boundary; weights are already bf16. Only a tiny batch-row
    # pad of the narrow (batch, n_in) input remains, and only if needed — the
    # old (b_pad, 128) f32 pad kernel is gone.
    xb = x.astype(jnp.bfloat16)
    if b_pad != batch:
        xb = jnp.pad(xb, ((0, b_pad - batch), (0, 0)))

    const = lambda i: (0, 0)  # weights/biases resident in VMEM across batch tiles

    q_pad, act_pad = pl.pallas_call(
        dqn_kernel,
        out_shape=(
            jax.ShapeDtypeStruct((b_pad, n_act), jnp.float32),
            jax.ShapeDtypeStruct((b_pad, 1), jnp.int32),
        ),
        grid=(n_tiles,),
        in_specs=[
            pl.BlockSpec((tile_b, n_in), lambda i: (i, 0)),   # x tile (bf16)
            pl.BlockSpec((n_in, HIDDEN), const),              # w1 (bf16)
            pl.BlockSpec((1, HIDDEN), const),                 # b1 (f32)
            pl.BlockSpec((HIDDEN, HIDDEN), const),            # w2 (bf16)
            pl.BlockSpec((1, HIDDEN), const),                 # b2 (f32)
            pl.BlockSpec((HIDDEN, n_act), const),             # w3 (bf16)
            pl.BlockSpec((1, n_act), const),                  # b3 (f32)
        ],
        out_specs=(
            pl.BlockSpec((tile_b, n_act), lambda i: (i, 0)),  # Q values (narrow)
            pl.BlockSpec((tile_b, 1), lambda i: (i, 0)),      # greedy actions
        ),
        compiler_params=pltpu.CompilerParams(
            dimension_semantics=("parallel",),
            vmem_limit_bytes=32 * 1024 * 1024,
        ),
    )(xb, w1, b1, w2, b2, w3, b3)

    return q_pad[:batch], act_pad[:batch, 0]


def dqn_reference(x, packed):
    """Pure-JAX reference using the same packed (bf16-weight) parameters."""
    w1, b1, w2, b2, w3, b3 = packed
    xb = x.astype(jnp.bfloat16)
    h1 = jnp.maximum(
        jnp.dot(xb, w1, preferred_element_type=jnp.float32) + b1, 0.0)
    h2 = jnp.maximum(
        jnp.dot(h1.astype(jnp.bfloat16), w2,
                preferred_element_type=jnp.float32) + b2, 0.0)
    return jnp.dot(h2.astype(jnp.bfloat16), w3,
                   preferred_element_type=jnp.float32) + b3


if __name__ == "__main__":
    # CartPole: 4 state inputs, 2 actions. Batch of 200 spans 2 grid tiles, so
    # it exercises VMEM-resident weights across tiles, the ragged-row pad path,
    # and the 2-tile "parallel" split (both TensorCores on v7x).
    n_inputs, n_actions, batch = 4, 2, 200

    key = jax.random.PRNGKey(0)
    k_x, k_p = jax.random.split(key)
    x = jax.random.normal(k_x, (batch, n_inputs), jnp.float32)
    params = init_params(k_p, n_inputs, n_actions)
    packed = pack_params(params)

    q, actions = dqn_forward(x, packed)
    q = jax.block_until_ready(q)
    actions = jax.block_until_ready(actions)

    q_ref = dqn_reference(x, packed)

    assert q.shape == (batch, n_actions)
    assert actions.shape == (batch,)
    assert jnp.allclose(q, q_ref, atol=2e-3, rtol=2e-3)
    # Fused argmax must agree with argmax over the kernel's own Q values.
    assert jnp.array_equal(actions, jnp.argmax(q, axis=-1).astype(jnp.int32))

    print("KERNEL_OK")
</pallas_src>

<mosaic_0001>
module attributes {stable_mosaic.version = 11 : i64} {
  func.func @dqn_kernel(%arg0: i32, %arg1: memref<128x4xbf16, #tpu.memory_space<vmem>>, %arg2: memref<4x256xbf16, #tpu.memory_space<vmem>>, %arg3: memref<1x256xf32, #tpu.memory_space<vmem>>, %arg4: memref<256x256xbf16, #tpu.memory_space<vmem>>, %arg5: memref<1x256xf32, #tpu.memory_space<vmem>>, %arg6: memref<256x2xbf16, #tpu.memory_space<vmem>>, %arg7: memref<1x2xf32, #tpu.memory_space<vmem>>, %arg8: memref<128x2xf32, #tpu.memory_space<vmem>>, %arg9: memref<128x1xi32, #tpu.memory_space<vmem>>) attributes {dimension_semantics = [#tpu.dimension_semantics<parallel>], iteration_bounds = array<i64: 2>, scalar_prefetch = 0 : i64, scratch_operands = 0 : i64, tpu.core_type = #tpu.core_type<tc>, window_params = [{transform_indices = @transform_0, window_bounds = array<i64: 128, 4>}, {pipeline_mode = #tpu.pipeline_mode<synchronous>, transform_indices = @transform_1, window_bounds = array<i64: 4, 256>}, {pipeline_mode = #tpu.pipeline_mode<synchronous>, transform_indices = @transform_2, window_bounds = array<i64: 1, 256>}, {pipeline_mode = #tpu.pipeline_mode<synchronous>, transform_indices = @transform_3, window_bounds = array<i64: 256, 256>}, {pipeline_mode = #tpu.pipeline_mode<synchronous>, transform_indices = @transform_4, window_bounds = array<i64: 1, 256>}, {pipeline_mode = #tpu.pipeline_mode<synchronous>, transform_indices = @transform_5, window_bounds = array<i64: 256, 2>}, {pipeline_mode = #tpu.pipeline_mode<synchronous>, transform_indices = @transform_6, window_bounds = array<i64: 1, 2>}, {transform_indices = @transform_7, window_bounds = array<i64: 128, 2>}, {transform_indices = @transform_8, window_bounds = array<i64: 128, 1>}]} {
    %c0 = arith.constant 0 : index
    %c0_0 = arith.constant 0 : index
    %0 = vector.load %arg1[%c0, %c0_0] : memref<128x4xbf16, #tpu.memory_space<vmem>>, vector<128x4xbf16>
    %c0_1 = arith.constant 0 : index
    %c0_2 = arith.constant 0 : index
    %1 = vector.load %arg2[%c0_1, %c0_2] : memref<4x256xbf16, #tpu.memory_space<vmem>>, vector<4x256xbf16>
    %cst = arith.constant dense<0.000000e+00> : vector<128x256xf32>
    %2 = tpu.matmul %0, %1, %cst {dimension_numbers = #tpu.dot_dimension_numbers<[1], [0], [0], [1], [0, 0, 1, 1], [], []>} : vector<128x4xbf16>, vector<4x256xbf16>, vector<128x256xf32> -> vector<128x256xf32>
    %c0_3 = arith.constant 0 : index
    %c0_4 = arith.constant 0 : index
    %3 = vector.load %arg3[%c0_3, %c0_4] : memref<1x256xf32, #tpu.memory_space<vmem>>, vector<1x256xf32>
    %4 = vector.broadcast %3 : vector<1x256xf32> to vector<128x256xf32>
    %5 = arith.addf %2, %4 : vector<128x256xf32>
    %cst_5 = arith.constant 0.000000e+00 : f32
    %6 = vector.broadcast %cst_5 : f32 to vector<128x256xf32>
    %7 = arith.maximumf %5, %6 : vector<128x256xf32>
    %8 = arith.truncf %7 : vector<128x256xf32> to vector<128x256xbf16>
    %c0_6 = arith.constant 0 : index
    %c0_7 = arith.constant 0 : index
    %9 = vector.load %arg4[%c0_6, %c0_7] : memref<256x256xbf16, #tpu.memory_space<vmem>>, vector<256x256xbf16>
    %cst_8 = arith.constant dense<0.000000e+00> : vector<128x256xf32>
    %10 = tpu.matmul %8, %9, %cst_8 {dimension_numbers = #tpu.dot_dimension_numbers<[1], [0], [0], [1], [0, 0, 1, 1], [], []>} : vector<128x256xbf16>, vector<256x256xbf16>, vector<128x256xf32> -> vector<128x256xf32>
    %c0_9 = arith.constant 0 : index
    %c0_10 = arith.constant 0 : index
    %11 = vector.load %arg5[%c0_9, %c0_10] : memref<1x256xf32, #tpu.memory_space<vmem>>, vector<1x256xf32>
    %12 = vector.broadcast %11 : vector<1x256xf32> to vector<128x256xf32>
    %13 = arith.addf %10, %12 : vector<128x256xf32>
    %cst_11 = arith.constant 0.000000e+00 : f32
    %14 = vector.broadcast %cst_11 : f32 to vector<128x256xf32>
    %15 = arith.maximumf %13, %14 : vector<128x256xf32>
    %16 = arith.truncf %15 : vector<128x256xf32> to vector<128x256xbf16>
    %c0_12 = arith.constant 0 : index
    %c0_13 = arith.constant 0 : index
    %17 = vector.load %arg6[%c0_12, %c0_13] : memref<256x2xbf16, #tpu.memory_space<vmem>>, vector<256x2xbf16>
    %cst_14 = arith.constant dense<0.000000e+00> : vector<128x2xf32>
    %18 = tpu.matmul %16, %17, %cst_14 {dimension_numbers = #tpu.dot_dimension_numbers<[1], [0], [0], [1], [0, 0, 1, 1], [], []>} : vector<128x256xbf16>, vector<256x2xbf16>, vector<128x2xf32> -> vector<128x2xf32>
    %c0_15 = arith.constant 0 : index
    %c0_16 = arith.constant 0 : index
    %19 = vector.load %arg7[%c0_15, %c0_16] : memref<1x2xf32, #tpu.memory_space<vmem>>, vector<1x2xf32>
    %20 = vector.broadcast %19 : vector<1x2xf32> to vector<128x2xf32>
    %21 = arith.addf %18, %20 : vector<128x2xf32>
    %c0_17 = arith.constant 0 : index
    %c0_18 = arith.constant 0 : index
    %22 = vector.load %arg8[%c0_17, %c0_18] : memref<128x2xf32, #tpu.memory_space<vmem>>, vector<128x2xf32>
    tpu.vector_store %arg8[%c0_17, %c0_18], %21 {strides = array<i32>} : memref<128x2xf32, #tpu.memory_space<vmem>>, vector<128x2xf32>,
    %23 = tpu.iota {dimensions = array<i32: 1>} : vector<128x2xi32>
    %cst_19 = arith.constant dense<0xFF800000> : vector<128xf32>
    %24 = vector.multi_reduction <maximumf>, %21, %cst_19 [1] : vector<128x2xf32> to vector<128xf32>
    %25 = vector.shape_cast %24 : vector<128xf32> to vector<128x1xf32>
    %26 = vector.broadcast %25 : vector<128x1xf32> to vector<128x2xf32>
    %27 = arith.cmpf oeq, %21, %26 : vector<128x2xf32>
    %c2_i32 = arith.constant 2 : i32
    %28 = vector.broadcast %c2_i32 : i32 to vector<128x2xi32>
    %29 = arith.select %27, %23, %28 : vector<128x2xi1>, vector<128x2xi32>
    %cst_20 = arith.constant dense<2147483647> : vector<128xi32>
    %30 = vector.multi_reduction <minsi>, %29, %cst_20 [1] : vector<128x2xi32> to vector<128xi32>
    %31 = vector.shape_cast %30 : vector<128xi32> to vector<128x1xi32>
    %c0_21 = arith.constant 0 : index
    %c0_22 = arith.constant 0 : index
    %32 = vector.load %arg9[%c0_21, %c0_22] : memref<128x1xi32, #tpu.memory_space<vmem>>, vector<128x1xi32>
    tpu.vector_store %arg9[%c0_21, %c0_22], %31 {strides = array<i32>} : memref<128x1xi32, #tpu.memory_space<vmem>>, vector<128x1xi32>,
    return
  }
  func.func @transform_0(%arg0: i32) -> (i32, i32) {
    %c0_i32 = arith.constant 0 : i32
    %c0_i32_0 = arith.constant 0 : i32
    return %arg0, %c0_i32 : i32, i32
  }
  func.func @transform_1(%arg0: i32) -> (i32, i32) {
    %c0_i32 = arith.constant 0 : i32
    %c0_i32_0 = arith.constant 0 : i32
    %c0_i32_1 = arith.constant 0 : i32
    return %c0_i32, %c0_i32_0 : i32, i32
  }
  func.func @transform_2(%arg0: i32) -> (i32, i32) {
    %c0_i32 = arith.constant 0 : i32
    %c0_i32_0 = arith.constant 0 : i32
    %c0_i32_1 = arith.constant 0 : i32
    return %c0_i32, %c0_i32_0 : i32, i32
  }
  func.func @transform_3(%arg0: i32) -> (i32, i32) {
    %c0_i32 = arith.constant 0 : i32
    %c0_i32_0 = arith.constant 0 : i32
    %c0_i32_1 = arith.constant 0 : i32
    return %c0_i32, %c0_i32_0 : i32, i32
  }
  func.func @transform_4(%arg0: i32) -> (i32, i32) {
    %c0_i32 = arith.constant 0 : i32
    %c0_i32_0 = arith.constant 0 : i32
    %c0_i32_1 = arith.constant 0 : i32
    return %c0_i32, %c0_i32_0 : i32, i32
  }
  func.func @transform_5(%arg0: i32) -> (i32, i32) {
    %c0_i32 = arith.constant 0 : i32
    %c0_i32_0 = arith.constant 0 : i32
    %c0_i32_1 = arith.constant 0 : i32
    return %c0_i32, %c0_i32_0 : i32, i32
  }
  func.func @transform_6(%arg0: i32) -> (i32, i32) {
    %c0_i32 = arith.constant 0 : i32
    %c0_i32_0 = arith.constant 0 : i32
    %c0_i32_1 = arith.constant 0 : i32
    return %c0_i32, %c0_i32_0 : i32, i32
  }
  func.func @transform_7(%arg0: i32) -> (i32, i32) {
    %c0_i32 = arith.constant 0 : i32
    %c0_i32_0 = arith.constant 0 : i32
    return %arg0, %c0_i32 : i32, i32
  }
  func.func @transform_8(%arg0: i32) -> (i32, i32) {
    %c0_i32 = arith.constant 0 : i32
    %c0_i32_0 = arith.constant 0 : i32
    return %arg0, %c0_i32 : i32, i32
  }
}

</mosaic_0001>

<bundles_post_ra>
// kernel: dqn_forward.1
= control target key start
LH: loop header
LB: loop body
LE: loop exit
PB: predicated region body
PF: predicated region fallthrough
CT: control target
= control target key end

     0   :  { %s1917_s27 = smov 0   ;;  %s2621_s0 = inlined_call_operand.vmem [shape: bf16[256,4], index: 0, kind: input, shape index: {}]   ;;  %s2622_s1 = inlined_call_operand.vmem [shape: bf16[4,256], index: 1, kind: input, shape index: {}]   ;;  %s2623_s2 = inlined_call_operand.vmem [shape: f32[1,256], index: 2, kind: input, shape index: {}]   ;;  %s2624_s3 = inlined_call_operand.vmem [shape: bf16[256,256], index: 3, kind: input, shape index: {}]   ;;  %s2625_s4 = inlined_call_operand.vmem [shape: f32[1,256], index: 4, kind: input, shape index: {}]   ;;  %s2626_s5 = inlined_call_operand.vmem [shape: bf16[256,2], index: 5, kind: input, shape index: {}]   ;;  %s2627_s6 = inlined_call_operand.vmem [shape: f32[1,2], index: 6, kind: input, shape index: {}]   ;;  %s2628_s7 = inlined_call_operand.vmem [shape: f32[256,2], index: 7, kind: output, shape index: {0}]   ;;  %s2629_s8 = inlined_call_operand.vmem [shape: s32[256,1], index: 8, kind: output, shape index: {1}]  }
   0x1 LB: > { %s1638_s28 = sadd.s32 4294967295, %s1869_s27   ;;  %p1642_p0 = scmp.ge.s32.totalorder %s1869_s27, 1  ;;  %s1869_s27 = sphi %s1917_s27, %s19_s27  }
   0x2   : > { %p266_p1 = scmp.lt.s32.totalorder %s1869_s27, 3 }
   0x4   : > { %p267_p2 = pnand %p1642_p0, %p266_p1 }
   0x5   : > { %v1657_v0 = vld.sshfl [vmem:[%s2622_s1] sm:$0x33 pattern:$0x76325410] (!%p267_p2)  ;;  %vm427_vm0 = vcmask (!%p267_p2), 1041408   ;;  %v1871_v3 = vmov (!%p267_p2), 0   ;;  %v343_v58 = vlaneseq (!%p267_p2) }
   0x6   : > { %270 = sbr.rel (%p267_p2) target bundleno = 1177 (0x499), region = 48  ;;  %v401_v1 = vcombine.high (!%p267_p2), %v1657_v0, %v1657_v0  ;;  %v429_v2 = vsel (!%p267_p2), %vm427_vm0, %v1657_v0, 0  ;;  %466 = vmatprep.mubr.bf16.mxu0 (!%p267_p2), %v1871_v3  ;;  %s1643_s9 = sshll.u32 (!%p267_p2), %s1638_s28, 4  ;;  %v1799_v4 = vld [vmem:[%s2624_s3 + $0x4] ss:$8 sps:$4 sm:$0xff] (!%p267_p2)   ;;  %vm402_vm1 = vcmask (!%p267_p2), 31744  }
   0x7   : > { %p306_p3 = scmp.lt.s32.totalorder (!%p267_p2), %s1643_s9, 31  ;;  %v1801_v5 = vld [vmem:[%s2624_s3] ss:$8 sps:$4 sm:$0xff] (!%p267_p2)   ;;  %v1802_v6 = vld [vmem:[%s2624_s3 + $0x14] ss:$8 sps:$4 sm:$0xff] (!%p267_p2)   ;;  %799 = vmatprep.subr.bf16.mxu1 (!%p267_p2), %v1799_v4  ;;  %v2099_v59 = vshrl.u32 (!%p267_p2), %v343_v58, 7 }
   0x8   : > { %1658 = vmatprep.subr.msk.bf16.mxu0 (!%p267_p2), %vm427_vm0, %v401_v1  ;;  %800 = vmatpush1.bf16.msra.mxu1 (!%p267_p2), %v1801_v5  ;;  %v1804_v7 = vld [vmem:[%s2624_s3 + $0x10] ss:$8 sps:$4 sm:$0xff] (!%p267_p2)   ;;  %v1805_v8 = vld [vmem:[%s2624_s3 + $0x24] ss:$8 sps:$4 sm:$0xff] (!%p267_p2)   ;;  %v1807_v10 = vld [vmem:[%s2624_s3 + $0x20] ss:$8 sps:$4 sm:$0xff] (!%p267_p2)  }
   0x9   : > { %435 = vmatpush1.bf16.msra.mxu0 (!%p267_p2), %v429_v2  ;;  %801 = vmatprep.subr.bf16.mxu1 (!%p267_p2), %v1802_v6  ;;  %v1808_v11 = vld [vmem:[%s2624_s3 + $0x34] ss:$8 sps:$4 sm:$0xff] (!%p267_p2)   ;;  %v1810_v12 = vld [vmem:[%s2624_s3 + $0x30] ss:$8 sps:$4 sm:$0xff] (!%p267_p2)   ;;  %v1811_v13 = vld [vmem:[%s2624_s3 + $0x44] ss:$8 sps:$4 sm:$0xff] (!%p267_p2)  }
   0xa   : > { %v1813_v15 = vld [vmem:[%s2624_s3 + $0x40] ss:$8 sps:$4 sm:$0xff] (!%p267_p2)   ;;  %v1814_v16 = vld [vmem:[%s2624_s3 + $0x54] ss:$8 sps:$4 sm:$0xff] (!%p267_p2)   ;;  %v1816_v18 = vld [vmem:[%s2624_s3 + $0x50] ss:$8 sps:$4 sm:$0xff] (!%p267_p2)  }
   0xb   : > { %v1817_v19 = vld [vmem:[%s2624_s3 + $0x64] ss:$8 sps:$4 sm:$0xff] (!%p267_p2)   ;;  %v1819_v20 = vld [vmem:[%s2624_s3 + $0x60] ss:$8 sps:$4 sm:$0xff] (!%p267_p2)   ;;  %v1820_v21 = vld [vmem:[%s2624_s3 + $0x74] ss:$8 sps:$4 sm:$0xff] (!%p267_p2)  }
   0xc   : > { %802 = vmatpush1.bf16.msra.mxu1 (!%p267_p2), %v1804_v7  ;;  %v1822_v22 = vld [vmem:[%s2624_s3 + $0x70] ss:$8 sps:$4 sm:$0xff] (!%p267_p2)   ;;  %v1823_v24 = vld [vmem:[%s2624_s3 + $0x84] ss:$8 sps:$4 sm:$0xff] (!%p267_p2)   ;;  %v1825_v25 = vld [vmem:[%s2624_s3 + $0x80] ss:$8 sps:$4 sm:$0xff] (!%p267_p2)  }
   0xd   : > { %s2631_s9 = smov (!%p306_p3, %s1643_s9), 31  ;;  %803 = vmatprep.subr.bf16.mxu1 %v1805_v8  ;;  %v1826_v26 = vld [vmem:[%s2624_s3 + $0x94] ss:$8 sps:$4 sm:$0xff]   ;;  %v1828_v27 = vld [vmem:[%s2624_s3 + $0x90] ss:$8 sps:$4 sm:$0xff]   ;;  %v1847_v44 = vld [vmem:[%s2626_s5 + $0x40] sm:$0xff]  }
   0xe   : > { %s1644_s18 = sshll.u32 %s2631_s9, 2  ;;  %v1829_v29 = vld [vmem:[%s2624_s3 + $0xa4] ss:$8 sps:$4 sm:$0xff]   ;;  %v1831_v30 = vld [vmem:[%s2624_s3 + $0xa0] ss:$8 sps:$4 sm:$0xff]   ;;  %1718 = vmatprep.subr.bf16.mxu0 %v1847_v44  ;;  %v1851_v48 = vld [vmem:[%s2626_s5 + $0x50] sm:$0xff]  }
   0xf   : > { %s1950_s23 = scalar_lea.vmem %s2621_s0, %s1644_s18  ;;  %v1832_v31 = vld [vmem:[%s2624_s3 + $0xb4] ss:$8 sps:$4 sm:$0xff]   ;;  %v1834_v32 = vld [vmem:[%s2624_s3 + $0xb0] ss:$8 sps:$4 sm:$0xff]   ;;  %v1835_v34 = vld [vmem:[%s2624_s3 + $0xc4] ss:$8 sps:$4 sm:$0xff]  }
  0x10   : > { %v1791_v9 = vld [vmem:[%s1950_s23] sm:$0xff]   ;;  %804 = vmatpush1.bf16.msra.mxu1 %v1807_v10  ;;  %v1792_v14 = vld [vmem:[%s1950_s23 + $0x8] sm:$0xff]   ;;  %v1793_v17 = vld [vmem:[%s1950_s23 + $0x10] sm:$0xff]   ;;  %v345_v60 = vsub.s32 0, %v2099_v59  ;;  %v349_v62 = vsub.s32 1, %v2099_v59  ;;  %s1646_s16 = sshll.u32 %s2631_s9, 3 }
  0x11   : > { %1659 = vmatmul.mubr.msk.bf16.vlgmr.msra.gmra.mrb[0].mxu0 %vm402_vm1, %v1791_v9  ;;  %805 = vmatprep.subr.bf16.mxu1 %v1808_v11  ;;  %v1794_v23 = vld [vmem:[%s1950_s23 + $0x18] sm:$0xff]   ;;  %v1795_v28 = vld [vmem:[%s1950_s23 + $0x20] sm:$0xff]   ;;  %v1796_v33 = vld [vmem:[%s1950_s23 + $0x28] sm:$0xff]   ;;  %s2206_s20 = scalar_lea.vmem %s2628_s7, %s1646_s16  ;;  %vm1192_vm2 = vcmask 15360   ;;  %s2570_s24 = scalar_lea.vmem %s2629_s8, %s1646_s16 }
  0x12   : > { %476 = vmatprep.mubr.bf16.mxu0 %v1871_v3  ;;  %v1837_v35 = vld [vmem:[%s2624_s3 + $0xc0] ss:$8 sps:$4 sm:$0xff]   ;;  %v1838_v36 = vld [vmem:[%s2624_s3 + $0xd4] ss:$8 sps:$4 sm:$0xff]   ;;  %v1840_v39 = vld [vmem:[%s2624_s3 + $0xd0] ss:$8 sps:$4 sm:$0xff]  }
  0x13   : > { %v1797_v37 = vld [vmem:[%s1950_s23 + $0x30] sm:$0xff]   ;;  %v1798_v38 = vld [vmem:[%s1950_s23 + $0x38] sm:$0xff]   ;;  %v1841_v40 = vld [vmem:[%s2624_s3 + $0xe4] ss:$8 sps:$4 sm:$0xff]  }
  0x14   : > { %806 = vmatpush1.bf16.msra.mxu1 %v1810_v12  ;;  %v1843_v41 = vld [vmem:[%s2624_s3 + $0xe0] ss:$8 sps:$4 sm:$0xff]   ;;  %v1844_v42 = vld [vmem:[%s2624_s3 + $0xf4] ss:$8 sps:$4 sm:$0xff]   ;;  %v1846_v43 = vld [vmem:[%s2624_s3 + $0xf0] ss:$8 sps:$4 sm:$0xff]  }
  0x15   : > { %807 = vmatprep.subr.bf16.mxu1 %v1811_v13  ;;  %v1848_v45 = vld [vmem:[%s2626_s5] sm:$0xff]   ;;  %v1849_v46 = vld [vmem:[%s2626_s5 + $0x48] sm:$0xff]   ;;  %v1852_v49 = vld [vmem:[%s2626_s5 + $0x10] sm:$0xff]  }
  0x16   : > { %1719 = vmatpush3.bf16.msra.mxu0 %v1848_v45  ;;  %v1850_v47 = vld [vmem:[%s2626_s5 + $0x8] sm:$0xff]   ;;  %v1853_v50 = vld [vmem:[%s2626_s5 + $0x58] sm:$0xff]   ;;  %v1855_v52 = vld [vmem:[%s2626_s5 + $0x60] sm:$0xff]  }
  0x17   : > { %1720 = vmatprep.subr.bf16.mxu0 %v1849_v46  ;;  %v1854_v51 = vld [vmem:[%s2626_s5 + $0x18] sm:$0xff]   ;;  %v1856_v53 = vld [vmem:[%s2626_s5 + $0x20] sm:$0xff]   ;;  %v1857_v54 = vld [vmem:[%s2626_s5 + $0x68] sm:$0xff]  }
  0x18   : > { %808 = vmatpush1.bf16.msra.mxu1 %v1813_v15  ;;  %v1858_v55 = vld [vmem:[%s2626_s5 + $0x28] sm:$0xff]   ;;  %v1859_v56 = vld [vmem:[%s2626_s5 + $0x70] sm:$0xff]   ;;  %v341_v61 = vld [vmem:[%s2623_s2] sm:$0x3] }
  0x19   : > { %1660 = vmatmul.mubr.msk.bf16.gmra.mrb[4].mxu0 %vm402_vm1, %v1792_v14  ;;  %809 = vmatprep.subr.bf16.mxu1 %v1814_v16  ;;  %v1860_v57 = vld [vmem:[%s2626_s5 + $0x30] sm:$0xff]   ;;  %v2108_v63 = vrot.slane %v341_v61, %v345_v60  ;;  %v2112_v0 = vrot.slane %v341_v61, %v349_v62 }
  0x1a   : > { %486 = vmatprep.mubr.bf16.mxu0 %v1871_v3  ;;  %1721 = vmatpush3.bf16.msra.mxu0 %v1850_v47 }
  0x1b   : > { %1722 = vmatprep.subr.bf16.mxu0 %v1851_v48 }
  0x1c   : > { %810 = vmatpush1.bf16.msra.mxu1 %v1816_v18 }
  0x1d   : > { %811 = vmatprep.subr.bf16.mxu1 %v1817_v19 }
  0x1e   : > { %1723 = vmatpush3.bf16.msra.mxu0 %v1852_v49 }
  0x1f   : > { %1724 = vmatprep.subr.bf16.mxu0 %v1853_v50 }
  0x20   : > { %812 = vmatpush1.bf16.msra.mxu1 %v1819_v20 }
  0x21   : > { %1661 = vmatmul.mubr.msk.bf16.gmra.mrb[8].mxu0 %vm402_vm1, %v1793_v17  ;;  %813 = vmatprep.subr.bf16.mxu1 %v1820_v21 }
  0x22   : > { %496 = vmatprep.mubr.bf16.mxu0 %v1871_v3  ;;  %1725 = vmatpush3.bf16.msra.mxu0 %v1854_v51 }
  0x23   : > { %1726 = vmatprep.subr.bf16.mxu0 %v1855_v52 }
  0x24   : > { %814 = vmatpush1.bf16.msra.mxu1 %v1822_v22 }
  0x25   : > { %815 = vmatprep.subr.bf16.mxu1 %v1823_v24 }
  0x26   : > { %1727 = vmatpush3.bf16.msra.mxu0 %v1856_v53 }
  0x27   : > { %1728 = vmatprep.subr.bf16.mxu0 %v1857_v54 }
  0x28   : > { %816 = vmatpush1.bf16.msra.mxu1 %v1825_v25 }
  0x29   : > { %1662 = vmatmul.mubr.msk.bf16.gmra.mrb[12].mxu0 %vm402_vm1, %v1794_v23  ;;  %817 = vmatprep.subr.bf16.mxu1 %v1826_v26 }
  0x2a   : > { %506 = vmatprep.mubr.bf16.mxu0 %v1871_v3  ;;  %1729 = vmatpush3.bf16.msra.mxu0 %v1858_v55 }
  0x2b   : > { %1730 = vmatprep.subr.bf16.mxu0 %v1859_v56 }
  0x2c   : > { %818 = vmatpush1.bf16.msra.mxu1 %v1828_v27 }
  0x2d   : > { %819 = vmatprep.subr.bf16.mxu1 %v1829_v29 }
  0x2e   : > { %1731 = vmatpush3.bf16.msra.mxu0 %v1860_v57 }
  0x30   : > { %820 = vmatpush1.bf16.msra.mxu1 %v1831_v30 }
  0x31   : > { %1663 = vmatmul.mubr.msk.bf16.gmra.mrb[16].mxu0 %vm402_vm1, %v1795_v28  ;;  %821 = vmatprep.subr.bf16.mxu1 %v1832_v31 }
  0x32   : > { %516 = vmatprep.mubr.bf16.mxu0 %v1871_v3 }
  0x34   : > { %822 = vmatpush1.bf16.msra.mxu1 %v1834_v32 }
  0x35   : > { %823 = vmatprep.subr.bf16.mxu1 %v1835_v34 }
  0x38   : > { %824 = vmatpush1.bf16.msra.mxu1 %v1837_v35 }
  0x39   : > { %1664 = vmatmul.mubr.msk.bf16.gmra.mrb[20].mxu0 %vm402_vm1, %v1796_v33  ;;  %825 = vmatprep.subr.bf16.mxu1 %v1838_v36 }
  0x3a   : > { %526 = vmatprep.mubr.bf16.mxu0 %v1871_v3 }
  0x3c   : > { %826 = vmatpush1.bf16.msra.mxu1 %v1840_v39 }
  0x3d   : > { %827 = vmatprep.subr.bf16.mxu1 %v1841_v40 }
  0x40   : > { %828 = vmatpush1.bf16.msra.mxu1 %v1843_v41 }
  0x41   : > { %1665 = vmatmul.mubr.msk.bf16.gmra.mrb[24].mxu0 %vm402_vm1, %v1797_v37  ;;  %829 = vmatprep.subr.bf16.mxu1 %v1844_v42 }
  0x42   : > { %536 = vmatprep.mubr.bf16.mxu0 %v1871_v3 }
  0x44   : > { %830 = vmatpush1.bf16.msra.mxu1 %v1846_v43 }
  0x49   : > { %1666 = vmatmul.mubr.msk.bf16.gmra.mrb[28].mxu0 %vm402_vm1, %v1798_v38 }
  0xe4   : > { %v468_v1 = vpop.f32.mrb[0].mxu0 }
  0xe5   : > { %v469_v2 = vadd.f32 %v468_v1, %v2108_v63  ;;  %v470_v3 = vpop.f32.mrb[1].mxu0 }
  0xe6   : > { %v471_v4 = vadd.f32 %v470_v3, %v2112_v0  ;;  %v472_v5 = vpop.f32.mrb[2].mxu0 }
  0xe7   : > { %v473_v6 = vadd.f32 %v472_v5, %v2108_v63  ;;  %v474_v7 = vpop.f32.mrb[3].mxu0  ;;  %v547_v9 = vmax.f32 %v469_v2, 0.0 }
  0xe8   : > { %v475_v8 = vadd.f32 %v474_v7, %v2112_v0  ;;  %v548_v11 = vmax.f32 %v471_v4, 0.0 }
  0xe9   : > { %v549_v10 = vmax.f32 %v473_v6, 0.0 }
  0xea   : > { %v550_v12 = vmax.f32 %v475_v8, 0.0 }
  0xeb   : > { %v579_v13 = vpack.c.bf16 %v549_v10, %v547_v9 }
  0xec   : > { %v478_v14 = vpop.f32.mrb[4].mxu0  ;;  %v580_v15 = vpack.c.bf16 %v550_v12, %v548_v11 }
  0xed   : > { %v479_v16 = vadd.f32 %v478_v14, %v2108_v63  ;;  %v480_v17 = vpop.f32.mrb[5].mxu0 }
  0xee   : > { %v481_v18 = vadd.f32 %v480_v17, %v2112_v0  ;;  %v482_v19 = vpop.f32.mrb[6].mxu0  ;;  %831 = vmatprep.mubr.bf16.mxu1 %v580_v15 }
  0xef   : > { %v483_v20 = vadd.f32 %v482_v19, %v2108_v63  ;;  %v484_v21 = vpop.f32.mrb[7].mxu0  ;;  %832 = vmatmul.mubr.bf16.vlgmr.msra.gmra.mrb[0].mxu1 %v579_v13  ;;  %v551_v23 = vmax.f32 %v479_v16, 0.0 }
  0xf0   : > { %v485_v22 = vadd.f32 %v484_v21, %v2112_v0  ;;  %v552_v25 = vmax.f32 %v481_v18, 0.0 }
  0xf1   : > { %v553_v24 = vmax.f32 %v483_v20, 0.0 }
  0xf2   : > { %v554_v26 = vmax.f32 %v485_v22, 0.0 }
  0xf3   : > { %v581_v27 = vpack.c.bf16 %v553_v24, %v551_v23 }
  0xf4   : > { %v582_v28 = vpack.c.bf16 %v554_v26, %v552_v25  ;;  %v488_v29 = vpop.f32.mrb[8].mxu0 }
  0xf5   : > { %v489_v30 = vadd.f32 %v488_v29, %v2108_v63  ;;  %v490_v31 = vpop.f32.mrb[9].mxu0 }
  0xf6   : > { %v491_v32 = vadd.f32 %v490_v31, %v2112_v0  ;;  %v492_v33 = vpop.f32.mrb[10].mxu0  ;;  %841 = vmatprep.mubr.bf16.mxu1 %v582_v28 }
  0xf7   : > { %v493_v34 = vadd.f32 %v492_v33, %v2108_v63  ;;  %v494_v35 = vpop.f32.mrb[11].mxu0  ;;  %842 = vmatmul.mubr.bf16.gmra.mrb[4].mxu1 %v581_v27  ;;  %v555_v37 = vmax.f32 %v489_v30, 0.0 }
  0xf8   : > { %v495_v36 = vadd.f32 %v494_v35, %v2112_v0  ;;  %v556_v39 = vmax.f32 %v491_v32, 0.0 }
  0xf9   : > { %v557_v38 = vmax.f32 %v493_v34, 0.0 }
  0xfa   : > { %v558_v40 = vmax.f32 %v495_v36, 0.0 }
  0xfb   : > { %v583_v41 = vpack.c.bf16 %v557_v38, %v555_v37 }
  0xfc   : > { %v584_v42 = vpack.c.bf16 %v558_v40, %v556_v39  ;;  %v498_v43 = vpop.f32.mrb[12].mxu0 }
  0xfd   : > { %v499_v44 = vadd.f32 %v498_v43, %v2108_v63  ;;  %v500_v45 = vpop.f32.mrb[13].mxu0 }
  0xfe   : > { %v501_v46 = vadd.f32 %v500_v45, %v2112_v0  ;;  %v502_v47 = vpop.f32.mrb[14].mxu0  ;;  %851 = vmatprep.mubr.bf16.mxu1 %v584_v42 }
  0xff   : > { %v503_v48 = vadd.f32 %v502_v47, %v2108_v63  ;;  %v504_v49 = vpop.f32.mrb[15].mxu0  ;;  %852 = vmatmul.mubr.bf16.gmra.mrb[8].mxu1 %v583_v41  ;;  %v559_v51 = vmax.f32 %v499_v44, 0.0 }
 0x100   : > { %v505_v50 = vadd.f32 %v504_v49, %v2112_v0  ;;  %v560_v53 = vmax.f32 %v501_v46, 0.0 }
 0x101   : > { %v561_v52 = vmax.f32 %v503_v48, 0.0 }
 0x102   : > { %v562_v54 = vmax.f32 %v505_v50, 0.0 }
 0x103   : > { %v585_v55 = vpack.c.bf16 %v561_v52, %v559_v51 }
 0x104   : > { %v586_v56 = vpack.c.bf16 %v562_v54, %v560_v53  ;;  %v508_v57 = vpop.f32.mrb[16].mxu0 }
 0x105   : > { %v509_v61 = vadd.f32 %v508_v57, %v2108_v63  ;;  %v510_v1 = vpop.f32.mrb[17].mxu0 }
 0x106   : > { %v511_v2 = vadd.f32 %v510_v1, %v2112_v0  ;;  %v512_v3 = vpop.f32.mrb[18].mxu0  ;;  %861 = vmatprep.mubr.bf16.mxu1 %v586_v56 }
 0x107   : > { %v513_v4 = vadd.f32 %v512_v3, %v2108_v63  ;;  %v514_v5 = vpop.f32.mrb[19].mxu0  ;;  %862 = vmatmul.mubr.bf16.gmra.mrb[12].mxu1 %v585_v55  ;;  %v563_v7 = vmax.f32 %v509_v61, 0.0  ;;  %v1861_v55 = vld [vmem:[%s2626_s5 + $0x78] sm:$0xff]  }
 0x108   : > { %v515_v6 = vadd.f32 %v514_v5, %v2112_v0  ;;  %v564_v9 = vmax.f32 %v511_v2, 0.0  ;;  %1732 = vmatprep.subr.bf16.mxu0 %v1861_v55 }
 0x109   : > { %v565_v8 = vmax.f32 %v513_v4, 0.0 }
 0x10a   : > { %v566_v10 = vmax.f32 %v515_v6, 0.0 }
 0x10b   : > { %v587_v11 = vpack.c.bf16 %v565_v8, %v563_v7 }
 0x10c   : > { %v588_v12 = vpack.c.bf16 %v566_v10, %v564_v9  ;;  %v518_v13 = vpop.f32.mrb[20].mxu0 }
 0x10d   : > { %v519_v14 = vadd.f32 %v518_v13, %v2108_v63  ;;  %v520_v15 = vpop.f32.mrb[21].mxu0 }
 0x10e   : > { %v521_v16 = vadd.f32 %v520_v15, %v2112_v0  ;;  %v522_v17 = vpop.f32.mrb[22].mxu0  ;;  %871 = vmatprep.mubr.bf16.mxu1 %v588_v12 }
 0x10f   : > { %v523_v18 = vadd.f32 %v522_v17, %v2108_v63  ;;  %v524_v19 = vpop.f32.mrb[23].mxu0  ;;  %872 = vmatmul.mubr.bf16.gmra.mrb[16].mxu1 %v587_v11  ;;  %v567_v21 = vmax.f32 %v519_v14, 0.0 }
 0x110   : > { %v525_v20 = vadd.f32 %v524_v19, %v2112_v0  ;;  %v568_v23 = vmax.f32 %v521_v16, 0.0 }
 0x111   : > { %v569_v22 = vmax.f32 %v523_v18, 0.0 }
 0x112   : > { %v570_v24 = vmax.f32 %v525_v20, 0.0 }
 0x113   : > { %v589_v25 = vpack.c.bf16 %v569_v22, %v567_v21 }
 0x114   : > { %v590_v26 = vpack.c.bf16 %v570_v24, %v568_v23  ;;  %v528_v27 = vpop.f32.mrb[24].mxu0 }
 0x115   : > { %v529_v28 = vadd.f32 %v528_v27, %v2108_v63  ;;  %v530_v29 = vpop.f32.mrb[25].mxu0 }
 0x116   : > { %v531_v30 = vadd.f32 %v530_v29, %v2112_v0  ;;  %v532_v31 = vpop.f32.mrb[26].mxu0  ;;  %881 = vmatprep.mubr.bf16.mxu1 %v590_v26 }
 0x117   : > { %v533_v32 = vadd.f32 %v532_v31, %v2108_v63  ;;  %v534_v33 = vpop.f32.mrb[27].mxu0  ;;  %882 = vmatmul.mubr.bf16.gmra.mrb[20].mxu1 %v589_v25  ;;  %v571_v35 = vmax.f32 %v529_v28, 0.0 }
 0x118   : > { %v535_v34 = vadd.f32 %v534_v33, %v2112_v0  ;;  %v572_v37 = vmax.f32 %v531_v30, 0.0 }
 0x119   : > { %v573_v36 = vmax.f32 %v533_v32, 0.0 }
 0x11a   : > { %v574_v38 = vmax.f32 %v535_v34, 0.0 }
 0x11b   : > { %v591_v39 = vpack.c.bf16 %v573_v36, %v571_v35 }
 0x11c   : > { %v592_v40 = vpack.c.bf16 %v574_v38, %v572_v37  ;;  %v538_v41 = vpop.f32.mrb[28].mxu0 }
 0x11d   : > { %v539_v42 = vadd.f32 %v538_v41, %v2108_v63  ;;  %v540_v43 = vpop.f32.mrb[29].mxu0 }
 0x11e   : > { %v541_v44 = vadd.f32 %v540_v43, %v2112_v0  ;;  %v542_v45 = vpop.f32.mrb[30].mxu0  ;;  %891 = vmatprep.mubr.bf16.mxu1 %v592_v40 }
 0x11f   : > { %v543_v46 = vadd.f32 %v542_v45, %v2108_v63  ;;  %v544_v47 = vpop.f32.mrb[31].mxu0  ;;  %892 = vmatmul.mubr.bf16.gmra.mrb[24].mxu1 %v591_v39  ;;  %v575_v49 = vmax.f32 %v539_v42, 0.0  ;;  %v1862_v63 = vld [vmem:[%s2626_s5 + $0x38] sm:$0xff]  }
 0x120   : > { %v545_v48 = vadd.f32 %v544_v47, %v2112_v0  ;;  %v576_v51 = vmax.f32 %v541_v44, 0.0  ;;  %1733 = vmatpush3.bf16.msra.mxu0 %v1862_v63  ;;  %v627_v0 = vld [vmem:[%s2625_s4] sm:$0x3] }
 0x121   : > { %v577_v50 = vmax.f32 %v543_v46, 0.0  ;;  %v2157_v56 = vrot.slane %v627_v0, %v345_v60  ;;  %v2161_v57 = vrot.slane %v627_v0, %v349_v62 }
 0x122   : > { %v578_v52 = vmax.f32 %v545_v48, 0.0 }
 0x123   : > { %v593_v53 = vpack.c.bf16 %v577_v50, %v575_v49 }
 0x124   : > { %v594_v54 = vpack.c.bf16 %v578_v52, %v576_v51 }
 0x126   : > { %901 = vmatprep.mubr.bf16.mxu1 %v594_v54 }
 0x127   : > { %902 = vmatmul.mubr.bf16.gmra.mrb[28].mxu1 %v593_v53 }
 0x1c2   : > { %v833_v61 = vpop.f32.mrb[0].mxu1 }
 0x1c3   : > { %v834_v1 = vadd.f32 %v833_v61, %v2157_v56  ;;  %v835_v2 = vpop.f32.mrb[1].mxu1 }
 0x1c4   : > { %v836_v3 = vadd.f32 %v835_v2, %v2161_v57  ;;  %v837_v4 = vpop.f32.mrb[2].mxu1 }
 0x1c5   : > { %v838_v5 = vadd.f32 %v837_v4, %v2157_v56  ;;  %v839_v6 = vpop.f32.mrb[3].mxu1  ;;  %v912_v8 = vmax.f32 %v834_v1, 0.0 }
 0x1c6   : > { %v840_v7 = vadd.f32 %v839_v6, %v2161_v57  ;;  %v913_v60 = vmax.f32 %v836_v3, 0.0 }
 0x1c7   : > { %v914_v9 = vmax.f32 %v838_v5, 0.0 }
 0x1c8   : > { %v915_v10 = vmax.f32 %v840_v7, 0.0 }
 0x1c9   : > { %v944_v11 = vpack.c.bf16 %v914_v9, %v912_v8 }
 0x1ca   : > { %v945_v59 = vpack.c.bf16 %v915_v10, %v913_v60  ;;  %v843_v62 = vpop.f32.mrb[4].mxu1 }
 0x1cb   : > { %v844_v12 = vadd.f32 %v843_v62, %v2157_v56  ;;  %v845_v13 = vpop.f32.mrb[5].mxu1 }
 0x1cc   : > { %v846_v14 = vadd.f32 %v845_v13, %v2161_v57  ;;  %v847_v15 = vpop.f32.mrb[6].mxu1  ;;  %1127 = vmatprep.mubr.bf16.mxu0 %v945_v59 }
 0x1cd   : > { %v848_v16 = vadd.f32 %v847_v15, %v2157_v56  ;;  %v849_v17 = vpop.f32.mrb[7].mxu1  ;;  %1128 = vmatmul.mubr.bf16.vlgmr.msra.gmra.mrb[32].mxu0 %v944_v11  ;;  %v916_v19 = vmax.f32 %v844_v12, 0.0 }
 0x1ce   : > { %v850_v18 = vadd.f32 %v849_v17, %v2161_v57  ;;  %v917_v21 = vmax.f32 %v846_v14, 0.0 }
 0x1cf   : > { %v918_v20 = vmax.f32 %v848_v16, 0.0 }
 0x1d0   : > { %v919_v22 = vmax.f32 %v850_v18, 0.0 }
 0x1d1   : > { %v946_v23 = vpack.c.bf16 %v918_v20, %v916_v19 }
 0x1d2   : > { %v947_v24 = vpack.c.bf16 %v919_v22, %v917_v21  ;;  %v853_v25 = vpop.f32.mrb[8].mxu1 }
 0x1d3   : > { %v854_v26 = vadd.f32 %v853_v25, %v2157_v56  ;;  %v855_v27 = vpop.f32.mrb[9].mxu1 }
 0x1d4   : > { %v856_v28 = vadd.f32 %v855_v27, %v2161_v57  ;;  %v857_v29 = vpop.f32.mrb[10].mxu1  ;;  %1135 = vmatprep.mubr.bf16.mxu0 %v947_v24 }
 0x1d5   : > { %v858_v30 = vadd.f32 %v857_v29, %v2157_v56  ;;  %v859_v31 = vpop.f32.mrb[11].mxu1  ;;  %1136 = vmatmul.mubr.bf16.gmra.mrb[36].mxu0 %v946_v23  ;;  %v920_v33 = vmax.f32 %v854_v26, 0.0 }
 0x1d6   : > { %v860_v32 = vadd.f32 %v859_v31, %v2161_v57  ;;  %v921_v35 = vmax.f32 %v856_v28, 0.0 }
 0x1d7   : > { %v922_v34 = vmax.f32 %v858_v30, 0.0 }
 0x1d8   : > { %v923_v36 = vmax.f32 %v860_v32, 0.0 }
 0x1d9   : > { %v948_v37 = vpack.c.bf16 %v922_v34, %v920_v33 }
 0x1da   : > { %v949_v38 = vpack.c.bf16 %v923_v36, %v921_v35  ;;  %v863_v39 = vpop.f32.mrb[12].mxu1 }
 0x1db   : > { %v864_v40 = vadd.f32 %v863_v39, %v2157_v56  ;;  %v865_v41 = vpop.f32.mrb[13].mxu1 }
 0x1dc   : > { %v866_v42 = vadd.f32 %v865_v41, %v2161_v57  ;;  %v867_v43 = vpop.f32.mrb[14].mxu1  ;;  %1143 = vmatprep.mubr.bf16.mxu0 %v949_v38 }
 0x1dd   : > { %v868_v44 = vadd.f32 %v867_v43, %v2157_v56  ;;  %v869_v45 = vpop.f32.mrb[15].mxu1  ;;  %1144 = vmatmul.mubr.bf16.gmra.mrb[40].mxu0 %v948_v37  ;;  %v924_v47 = vmax.f32 %v864_v40, 0.0 }
 0x1de   : > { %v870_v46 = vadd.f32 %v869_v45, %v2161_v57  ;;  %v925_v49 = vmax.f32 %v866_v42, 0.0 }
 0x1df   : > { %v926_v48 = vmax.f32 %v868_v44, 0.0 }
 0x1e0   : > { %v927_v50 = vmax.f32 %v870_v46, 0.0 }
 0x1e1   : > { %v950_v51 = vpack.c.bf16 %v926_v48, %v924_v47 }
 0x1e2   : > { %v951_v52 = vpack.c.bf16 %v927_v50, %v925_v49  ;;  %v873_v53 = vpop.f32.mrb[16].mxu1  ;;  %v2199_v49 = vld [vmem:[%s2627_s6] ss:$0 sm:$0xff] }
 0x1e3   : > { %v874_v54 = vadd.f32 %v873_v53, %v2157_v56  ;;  %v875_v55 = vpop.f32.mrb[17].mxu1 }
 0x1e4   : > { %v876_v63 = vadd.f32 %v875_v55, %v2161_v57  ;;  %v877_v0 = vpop.f32.mrb[18].mxu1  ;;  %1151 = vmatprep.mubr.bf16.mxu0 %v951_v52 }
 0x1e5   : > { %v878_v61 = vadd.f32 %v877_v0, %v2157_v56  ;;  %v879_v1 = vpop.f32.mrb[19].mxu1  ;;  %1152 = vmatmul.mubr.bf16.gmra.mrb[44].mxu0 %v950_v51  ;;  %v928_v3 = vmax.f32 %v874_v54, 0.0 }
 0x1e6   : > { %v880_v2 = vadd.f32 %v879_v1, %v2161_v57  ;;  %v929_v5 = vmax.f32 %v876_v63, 0.0 }
 0x1e7   : > { %v930_v4 = vmax.f32 %v878_v61, 0.0 }
 0x1e8   : > { %v931_v6 = vmax.f32 %v880_v2, 0.0 }
 0x1e9   : > { %v952_v7 = vpack.c.bf16 %v930_v4, %v928_v3 }
 0x1ea   : > { %v953_v8 = vpack.c.bf16 %v931_v6, %v929_v5  ;;  %v883_v9 = vpop.f32.mrb[20].mxu1 }
 0x1eb   : > { %v884_v60 = vadd.f32 %v883_v9, %v2157_v56  ;;  %v885_v10 = vpop.f32.mrb[21].mxu1 }
 0x1ec   : > { %v886_v11 = vadd.f32 %v885_v10, %v2161_v57  ;;  %v887_v59 = vpop.f32.mrb[22].mxu1  ;;  %1159 = vmatprep.mubr.bf16.mxu0 %v953_v8 }
 0x1ed   : > { %v888_v62 = vadd.f32 %v887_v59, %v2157_v56  ;;  %v889_v12 = vpop.f32.mrb[23].mxu1  ;;  %1160 = vmatmul.mubr.bf16.gmra.mrb[48].mxu0 %v952_v7  ;;  %v932_v14 = vmax.f32 %v884_v60, 0.0 }
 0x1ee   : > { %v890_v13 = vadd.f32 %v889_v12, %v2161_v57  ;;  %v933_v16 = vmax.f32 %v886_v11, 0.0 }
 0x1ef   : > { %v934_v15 = vmax.f32 %v888_v62, 0.0 }
 0x1f0   : > { %v935_v17 = vmax.f32 %v890_v13, 0.0 }
 0x1f1   : > { %v954_v18 = vpack.c.bf16 %v934_v15, %v932_v14 }
 0x1f2   : > { %v955_v19 = vpack.c.bf16 %v935_v17, %v933_v16  ;;  %v893_v20 = vpop.f32.mrb[24].mxu1 }
 0x1f3   : > { %v894_v21 = vadd.f32 %v893_v20, %v2157_v56  ;;  %v895_v22 = vpop.f32.mrb[25].mxu1 }
 0x1f4   : > { %v896_v23 = vadd.f32 %v895_v22, %v2161_v57  ;;  %v897_v24 = vpop.f32.mrb[26].mxu1  ;;  %1167 = vmatprep.mubr.bf16.mxu0 %v955_v19 }
 0x1f5   : > { %v898_v25 = vadd.f32 %v897_v24, %v2157_v56  ;;  %v899_v26 = vpop.f32.mrb[27].mxu1  ;;  %1168 = vmatmul.mubr.bf16.gmra.mrb[52].mxu0 %v954_v18  ;;  %v936_v28 = vmax.f32 %v894_v21, 0.0 }
 0x1f6   : > { %v900_v27 = vadd.f32 %v899_v26, %v2161_v57  ;;  %v937_v30 = vmax.f32 %v896_v23, 0.0 }
 0x1f7   : > { %v938_v29 = vmax.f32 %v898_v25, 0.0 }
 0x1f8   : > { %v939_v31 = vmax.f32 %v900_v27, 0.0 }
 0x1f9   : > { %v956_v32 = vpack.c.bf16 %v938_v29, %v936_v28 }
 0x1fa   : > { %v957_v33 = vpack.c.bf16 %v939_v31, %v937_v30  ;;  %v903_v34 = vpop.f32.mrb[28].mxu1 }
 0x1fb   : > { %v904_v35 = vadd.f32 %v903_v34, %v2157_v56  ;;  %v905_v36 = vpop.f32.mrb[29].mxu1 }
 0x1fc   : > { %v906_v37 = vadd.f32 %v905_v36, %v2161_v57  ;;  %v907_v38 = vpop.f32.mrb[30].mxu1  ;;  %1175 = vmatprep.mubr.bf16.mxu0 %v957_v33 }
 0x1fd   : > { %v908_v39 = vadd.f32 %v907_v38, %v2157_v56  ;;  %v909_v40 = vpop.f32.mrb[31].mxu1  ;;  %1176 = vmatmul.mubr.bf16.gmra.mrb[56].mxu0 %v956_v32  ;;  %v940_v42 = vmax.f32 %v904_v35, 0.0 }
 0x1fe   : > { %v910_v41 = vadd.f32 %v909_v40, %v2161_v57  ;;  %v941_v44 = vmax.f32 %v906_v37, 0.0 }
 0x1ff   : > { %v942_v43 = vmax.f32 %v908_v39, 0.0 }
 0x200   : > { %v943_v45 = vmax.f32 %v910_v41, 0.0 }
 0x201   : > { %v958_v46 = vpack.c.bf16 %v942_v43, %v940_v42 }
 0x202   : > { %v959_v47 = vpack.c.bf16 %v943_v45, %v941_v44 }
 0x204   : > { %1183 = vmatprep.mubr.bf16.mxu0 %v959_v47 }
 0x205   : > { %1184 = vmatmul.mubr.bf16.gmra.mrb[60].mxu0 %v958_v46 }
 0x2a0   : > { %v1734_v48 = vpop.f32.mrb[32].mxu0 }
 0x2a1   : > { %v1735_v56 = vpop.f32.mrb[33].mxu0 }
 0x2a2   : > { %v1736_v50 = vadd.f32 %v1735_v56, %v1734_v48  ;;  %v1737_v51 = vpop.f32.mrb[34].mxu0 }
 0x2a3   : > { %v1738_v57 = vpop.f32.mrb[35].mxu0 }
 0x2a4   : > { %v2209_v52 = vadd.f32 %v1736_v50, %v2199_v49  ;;  %v1739_v53 = vadd.f32 %v1738_v57, %v1737_v51 }
 0x2a6   : > { %1193 = vst.msk [vmem:[%s2206_s20] sm:$0xff] %vm1192_vm2, %v2209_v52  ;;  %v2215_v54 = vadd.f32 %v1739_v53, %v2199_v49  ;;  %v1211_v55 = vsel %vm1192_vm2, %v2209_v52, -inf }
 0x2a7   : > { %1212 = vmax.xlane.f32.xlu0 %v1211_v55 }
 0x2a8   : > { %1194 = vst.msk [vmem:[%s2206_s20 + $0x8] sm:$0xff] %vm1192_vm2, %v2215_v54  ;;  %v1740_v63 = vpop.f32.mrb[36].mxu0  ;;  %v1214_v2 = vsel %vm1192_vm2, %v2215_v54, -inf }
 0x2a9   : > { %v1741_v0 = vpop.f32.mrb[37].mxu0 }
 0x2aa   : > { %v1742_v61 = vadd.f32 %v1741_v0, %v1740_v63  ;;  %v1743_v1 = vpop.f32.mrb[38].mxu0 }
 0x2ab   : > { %v1744_v3 = vpop.f32.mrb[39].mxu0  ;;  %1215 = vmax.xlane.f32.xlu0 %v1214_v2 }
 0x2ac   : > { %v2225_v4 = vadd.f32 %v1742_v61, %v2199_v49  ;;  %v1745_v5 = vadd.f32 %v1744_v3, %v1743_v1 }
 0x2ae   : > { %1195 = vst.msk [vmem:[%s2206_s20 + $0x10] sm:$0xff] %vm1192_vm2, %v2225_v4  ;;  %v2231_v6 = vadd.f32 %v1745_v5, %v2199_v49  ;;  %v1217_v7 = vsel %vm1192_vm2, %v2225_v4, -inf }
 0x2af   : > { %1218 = vmax.xlane.f32.xlu1 %v1217_v7 }
 0x2b0   : > { %1196 = vst.msk [vmem:[%s2206_s20 + $0x18] sm:$0xff] %vm1192_vm2, %v2231_v6  ;;  %v1746_v8 = vpop.f32.mrb[40].mxu0  ;;  %v1220_v11 = vsel %vm1192_vm2, %v2231_v6, -inf }
 0x2b1   : > { %v1747_v9 = vpop.f32.mrb[41].mxu0 }
 0x2b2   : > { %v1748_v60 = vadd.f32 %v1747_v9, %v1746_v8  ;;  %v1749_v10 = vpop.f32.mrb[42].mxu0 }
 0x2b3   : > { %v1750_v59 = vpop.f32.mrb[43].mxu0  ;;  %1221 = vmax.xlane.f32.xlu1 %v1220_v11 }
 0x2b4   : > { %v2241_v62 = vadd.f32 %v1748_v60, %v2199_v49  ;;  %v1751_v12 = vadd.f32 %v1750_v59, %v1749_v10  ;;  %v2337_v10 = vand.u32 127, %v343_v58 }
 0x2b6   : > { %1197 = vst.msk [vmem:[%s2206_s20 + $0x20] sm:$0xff] %vm1192_vm2, %v2241_v62  ;;  %v2247_v13 = vadd.f32 %v1751_v12, %v2199_v49  ;;  %v1223_v14 = vsel %vm1192_vm2, %v2241_v62, -inf }
 0x2b7   : > { %1224 = vmax.xlane.f32.xlu0 %v1223_v14 }
 0x2b8   : > { %1198 = vst.msk [vmem:[%s2206_s20 + $0x28] sm:$0xff] %vm1192_vm2, %v2247_v13  ;;  %v1752_v15 = vpop.f32.mrb[44].mxu0  ;;  %v1226_v16 = vsel %vm1192_vm2, %v2247_v13, -inf }
 0x2b9   : > { %v1753_v17 = vpop.f32.mrb[45].mxu0  ;;  %1227 = vmax.xlane.f32.xlu1 %v1226_v16 }
 0x2ba   : > { %v1754_v18 = vadd.f32 %v1753_v17, %v1752_v15  ;;  %v1755_v19 = vpop.f32.mrb[46].mxu0 }
 0x2bb   : > { %v1756_v20 = vpop.f32.mrb[47].mxu0 }
 0x2bc   : > { %v2257_v21 = vadd.f32 %v1754_v18, %v2199_v49  ;;  %v1757_v22 = vadd.f32 %v1756_v20, %v1755_v19 }
 0x2be   : > { %1199 = vst.msk [vmem:[%s2206_s20 + $0x30] sm:$0xff] %vm1192_vm2, %v2257_v21  ;;  %v2263_v23 = vadd.f32 %v1757_v22, %v2199_v49  ;;  %v1229_v24 = vsel %vm1192_vm2, %v2257_v21, -inf }
 0x2bf   : > { %1230 = vmax.xlane.f32.xlu0 %v1229_v24 }
 0x2c0   : > { %1200 = vst.msk [vmem:[%s2206_s20 + $0x38] sm:$0xff] %vm1192_vm2, %v2263_v23  ;;  %v1758_v25 = vpop.f32.mrb[48].mxu0  ;;  %v1232_v26 = vsel %vm1192_vm2, %v2263_v23, -inf }
 0x2c1   : > { %v1759_v27 = vpop.f32.mrb[49].mxu0  ;;  %1233 = vmax.xlane.f32.xlu1 %v1232_v26 }
 0x2c2   : > { %v1760_v28 = vadd.f32 %v1759_v27, %v1758_v25  ;;  %v1761_v29 = vpop.f32.mrb[50].mxu0 }
 0x2c3   : > { %v1762_v30 = vpop.f32.mrb[51].mxu0 }
 0x2c4   : > { %v2273_v31 = vadd.f32 %v1760_v28, %v2199_v49  ;;  %v1763_v32 = vadd.f32 %v1762_v30, %v1761_v29 }
 0x2c6   : > { %1201 = vst.msk [vmem:[%s2206_s20 + $0x40] sm:$0xff] %vm1192_vm2, %v2273_v31  ;;  %v2279_v33 = vadd.f32 %v1763_v32, %v2199_v49  ;;  %v1235_v34 = vsel %vm1192_vm2, %v2273_v31, -inf }
 0x2c7   : > { %1236 = vmax.xlane.f32.xlu0 %v1235_v34 }
 0x2c8   : > { %1202 = vst.msk [vmem:[%s2206_s20 + $0x48] sm:$0xff] %vm1192_vm2, %v2279_v33  ;;  %v1764_v35 = vpop.f32.mrb[52].mxu0  ;;  %v1238_v36 = vsel %vm1192_vm2, %v2279_v33, -inf }
 0x2c9   : > { %v1765_v37 = vpop.f32.mrb[53].mxu0  ;;  %1239 = vmax.xlane.f32.xlu1 %v1238_v36 }
 0x2ca   : > { %v1766_v38 = vadd.f32 %v1765_v37, %v1764_v35  ;;  %v1767_v39 = vpop.f32.mrb[54].mxu0 }
 0x2cb   : > { %v1768_v40 = vpop.f32.mrb[55].mxu0 }
 0x2cc   : > { %v2289_v41 = vadd.f32 %v1766_v38, %v2199_v49  ;;  %v1769_v42 = vadd.f32 %v1768_v40, %v1767_v39 }
 0x2ce   : > { %1203 = vst.msk [vmem:[%s2206_s20 + $0x50] sm:$0xff] %vm1192_vm2, %v2289_v41  ;;  %v2295_v43 = vadd.f32 %v1769_v42, %v2199_v49  ;;  %v1241_v44 = vsel %vm1192_vm2, %v2289_v41, -inf }
 0x2cf   : > { %1242 = vmax.xlane.f32.xlu0 %v1241_v44 }
 0x2d0   : > { %1204 = vst.msk [vmem:[%s2206_s20 + $0x58] sm:$0xff] %vm1192_vm2, %v2295_v43  ;;  %v1770_v45 = vpop.f32.mrb[56].mxu0  ;;  %v1244_v46 = vsel %vm1192_vm2, %v2295_v43, -inf }
 0x2d1   : > { %v1771_v47 = vpop.f32.mrb[57].mxu0  ;;  %1245 = vmax.xlane.f32.xlu1 %v1244_v46 }
 0x2d2   : > { %v1772_v48 = vadd.f32 %v1771_v47, %v1770_v45  ;;  %v1773_v56 = vpop.f32.mrb[58].mxu0 }
 0x2d3   : > { %v1774_v50 = vpop.f32.mrb[59].mxu0 }
 0x2d4   : > { %v2305_v51 = vadd.f32 %v1772_v48, %v2199_v49  ;;  %v1775_v57 = vadd.f32 %v1774_v50, %v1773_v56 }
 0x2d6   : > { %1205 = vst.msk [vmem:[%s2206_s20 + $0x60] sm:$0xff] %vm1192_vm2, %v2305_v51  ;;  %v2311_v53 = vadd.f32 %v1775_v57, %v2199_v49  ;;  %v1247_v55 = vsel %vm1192_vm2, %v2305_v51, -inf }
 0x2d7   : > { %1248 = vmax.xlane.f32.xlu0 %v1247_v55 }
 0x2d8   : > { %1206 = vst.msk [vmem:[%s2206_s20 + $0x68] sm:$0xff] %vm1192_vm2, %v2311_v53  ;;  %v1776_v63 = vpop.f32.mrb[60].mxu0  ;;  %v1250_v0 = vsel %vm1192_vm2, %v2311_v53, -inf }
 0x2d9   : > { %v1777_v61 = vpop.f32.mrb[61].mxu0  ;;  %1251 = vmax.xlane.f32.xlu1 %v1250_v0 }
 0x2da   : > { %v1778_v1 = vadd.f32 %v1777_v61, %v1776_v63  ;;  %v1779_v2 = vpop.f32.mrb[62].mxu0 }
 0x2db   : > { %v1780_v3 = vpop.f32.mrb[63].mxu0 }
 0x2dc   : > { %v2321_v5 = vadd.f32 %v1778_v1, %v2199_v49  ;;  %v1781_v7 = vadd.f32 %v1780_v3, %v1779_v2 }
 0x2de   : > { %1207 = vst.msk [vmem:[%s2206_s20 + $0x70] sm:$0xff] %vm1192_vm2, %v2321_v5  ;;  %v2327_v8 = vadd.f32 %v1781_v7, %v2199_v49  ;;  %v1253_v9 = vsel %vm1192_vm2, %v2321_v5, -inf }
 0x2df   : > { %1254 = vmax.xlane.f32.xlu0 %v1253_v9 }
 0x2e0   : > { %1208 = vst.msk [vmem:[%s2206_s20 + $0x78] sm:$0xff] %vm1192_vm2, %v2327_v8  ;;  %v1256_v60 = vsel %vm1192_vm2, %v2327_v8, -inf }
 0x2e1   : > { %1257 = vmax.xlane.f32.xlu1 %v1256_v60 }
 0x334   : > { %v1213_v11 = vpop.xlane.xlu0 %1212 }
 0x335   : > { %vm1259_vm3 = vcmp.eq.f32.partialorder %v2209_v52, %v1213_v11 }
 0x336   : > { %v1275_v49 = vsel %vm1259_vm3, %v2337_v10, 2 }
 0x337   : > { %v2342_v59 = vsel %vm1192_vm2, %v1275_v49, 2147483647 }
 0x338   : > { %v1216_v12 = vpop.xlane.xlu0 %1215  ;;  %v1293_v14 = vshra.s32 %v2342_v59, 16 }
 0x339   : > { %vm1260_vm4 = vcmp.eq.f32.partialorder %v2215_v54, %v1216_v12 }
 0x33a   : > { %v1276_v15 = vsel %vm1260_vm4, %v2337_v10, 2  ;;  %v2347_v16 = vcvt.s32.f32 %v1293_v14 }
 0x33b   : > { %v2350_v58 = vsel %vm1192_vm2, %v1276_v15, 2147483647 }
 0x33c   : > { %v1219_v17 = vpop.xlane.xlu1 %1218  ;;  %1296 = vmin.xlane.f32.xlu0 %v2347_v16  ;;  %v1308_v52 = vshra.s32 %v2350_v58, 16 }
 0x33d   : > { %vm1261_vm5 = vcmp.eq.f32.partialorder %v2225_v4, %v1219_v17 }
 0x33e   : > { %v1277_v18 = vsel %vm1261_vm5, %v2337_v10, 2  ;;  %v2356_v19 = vcvt.s32.f32 %v1308_v52 }
 0x33f   : > { %v2359_v54 = vsel %vm1192_vm2, %v1277_v18, 2147483647 }
 0x340   : > { %v1222_v20 = vpop.xlane.xlu1 %1221  ;;  %1311 = vmin.xlane.f32.xlu1 %v2356_v19  ;;  %v1323_v22 = vshra.s32 %v2359_v54, 16 }
 0x341   : > { %vm1262_vm6 = vcmp.eq.f32.partialorder %v2231_v6, %v1222_v20 }
 0x342   : > { %v1278_v24 = vsel %vm1262_vm6, %v2337_v10, 2  ;;  %v2365_v25 = vcvt.s32.f32 %v1323_v22 }
 0x343   : > { %v2368_v4 = vsel %vm1192_vm2, %v1278_v24, 2147483647 }
 0x344   : > { %1326 = vmin.xlane.f32.xlu0 %v2365_v25  ;;  %v1225_v26 = vpop.xlane.xlu0 %1224  ;;  %v1338_v27 = vshra.s32 %v2368_v4, 16 }
 0x345   : > { %vm1263_vm7 = vcmp.eq.f32.partialorder %v2241_v62, %v1225_v26 }
 0x346   : > { %v1279_v28 = vsel %vm1263_vm7, %v2337_v10, 2  ;;  %v1228_v29 = vpop.xlane.xlu1 %1227  ;;  %v2374_v30 = vcvt.s32.f32 %v1338_v27 }
 0x347   : > { %v2377_v6 = vsel %vm1192_vm2, %v1279_v28, 2147483647  ;;  %vm1264_vm8 = vcmp.eq.f32.partialorder %v2247_v13, %v1228_v29 }
 0x348   : > { %v1280_v32 = vsel %vm1264_vm8, %v2337_v10, 2  ;;  %1341 = vmin.xlane.f32.xlu1 %v2374_v30  ;;  %v1353_v34 = vshra.s32 %v2377_v6, 16 }
 0x349   : > { %v2384_v35 = vsel %vm1192_vm2, %v1280_v32, 2147483647 }
 0x34a   : > { %v2386_v62 = vcvt.s32.f32 %v1353_v34  ;;  %v1368_v36 = vshra.s32 %v2384_v35, 16 }
 0x34c   : > { %1356 = vmin.xlane.f32.xlu0 %v2386_v62  ;;  %v1231_v37 = vpop.xlane.xlu0 %1230  ;;  %v2390_v38 = vcvt.s32.f32 %v1368_v36 }
 0x34d   : > { %vm1265_vm9 = vcmp.eq.f32.partialorder %v2257_v21, %v1231_v37  ;;  %v1292_v37 = vand.u32 65535, %v2342_v59 }
 0x34e   : > { %v1281_v13 = vsel %vm1265_vm9, %v2337_v10, 2  ;;  %v1234_v39 = vpop.xlane.xlu1 %1233  ;;  %1371 = vmin.xlane.f32.xlu1 %v2390_v38 }
 0x34f   : > { %v2396_v40 = vsel %vm1192_vm2, %v1281_v13, 2147483647  ;;  %vm1266_vm10 = vcmp.eq.f32.partialorder %v2263_v23, %v1234_v39  ;;  %v1307_v13 = vand.u32 65535, %v2350_v58  ;;  %v1337_v58 = vand.u32 65535, %v2368_v4 }
 0x350   : > { %v1282_v42 = vsel %vm1266_vm10, %v2337_v10, 2  ;;  %v1383_v44 = vshra.s32 %v2396_v40, 16 }
 0x351   : > { %v2402_v45 = vsel %vm1192_vm2, %v1282_v42, 2147483647 }
 0x352   : > { %v2404_v46 = vcvt.s32.f32 %v1383_v44  ;;  %v1398_v21 = vshra.s32 %v2402_v45, 16  ;;  %v1309_v44 = vcvt.s32.f32 %v1307_v13 }
 0x354   : > { %1386 = vmin.xlane.f32.xlu0 %v2404_v46  ;;  %v1237_v47 = vpop.xlane.xlu0 %1236  ;;  %v2408_v48 = vcvt.s32.f32 %v1398_v21  ;;  %v1322_v21 = vand.u32 65535, %v2359_v54  ;;  %v1352_v54 = vand.u32 65535, %v2377_v6 }
 0x355   : > { %vm1267_vm11 = vcmp.eq.f32.partialorder %v2273_v31, %v1237_v47 }
 0x356   : > { %v1283_v23 = vsel %vm1267_vm11, %v2337_v10, 2  ;;  %v1240_v56 = vpop.xlane.xlu1 %1239  ;;  %1401 = vmin.xlane.f32.xlu1 %v2408_v48  ;;  %v1354_v4 = vcvt.s32.f32 %v1352_v54 }
 0x357   : > { %v2414_v50 = vsel %vm1192_vm2, %v1283_v23, 2147483647  ;;  %vm1268_vm12 = vcmp.eq.f32.partialorder %v2279_v33, %v1240_v56  ;;  %v1324_v23 = vcvt.s32.f32 %v1322_v21 }
 0x358   : > { %v1284_v57 = vsel %vm1268_vm12, %v2337_v10, 2  ;;  %v1413_v55 = vshra.s32 %v2414_v50, 16 }
 0x359   : > { %v2420_v63 = vsel %vm1192_vm2, %v1284_v57, 2147483647  ;;  %v1339_v57 = vcvt.s32.f32 %v1337_v58 }
 0x35a   : > { %v2422_v0 = vcvt.s32.f32 %v1413_v55  ;;  %v1428_v31 = vshra.s32 %v2420_v63, 16  ;;  %v1367_v55 = vand.u32 65535, %v2384_v35  ;;  %v1397_v35 = vand.u32 65535, %v2402_v45 }
 0x35b   : > { %v1427_v45 = vand.u32 65535, %v2420_v63 }
 0x35c   : > { %1416 = vmin.xlane.f32.xlu0 %v2422_v0  ;;  %v1243_v61 = vpop.xlane.xlu0 %1242  ;;  %v2426_v1 = vcvt.s32.f32 %v1428_v31 }
 0x35d   : > { %vm1269_vm13 = vcmp.eq.f32.partialorder %v2289_v41, %v1243_v61 }
 0x35e   : > { %v1285_v33 = vsel %vm1269_vm13, %v2337_v10, 2  ;;  %v1246_v2 = vpop.xlane.xlu1 %1245  ;;  %1431 = vmin.xlane.f32.xlu1 %v2426_v1 }
 0x35f   : > { %v2432_v3 = vsel %vm1192_vm2, %v1285_v33, 2147483647  ;;  %vm1270_vm14 = vcmp.eq.f32.partialorder %v2295_v43, %v1246_v2  ;;  %v1369_v33 = vcvt.s32.f32 %v1367_v55 }
 0x360   : > { %v1286_v7 = vsel %vm1270_vm14, %v2337_v10, 2  ;;  %v1443_v9 = vshra.s32 %v2432_v3, 16 }
 0x361   : > { %v2438_v60 = vsel %vm1192_vm2, %v1286_v7, 2147483647 }
 0x362   : > { %v2440_v11 = vcvt.s32.f32 %v1443_v9  ;;  %v1458_v41 = vshra.s32 %v2438_v60, 16  ;;  %v1457_v63 = vand.u32 65535, %v2438_v60 }
 0x364   : > { %1446 = vmin.xlane.f32.xlu0 %v2440_v11  ;;  %v1249_v49 = vpop.xlane.xlu0 %1248  ;;  %v2444_v12 = vcvt.s32.f32 %v1458_v41  ;;  %v1399_v41 = vcvt.s32.f32 %v1397_v35 }
 0x365   : > { %vm1271_vm15 = vcmp.eq.f32.partialorder %v2305_v51, %v1249_v49 }
 0x366   : > { %v1287_v43 = vsel %vm1271_vm15, %v2337_v10, 2  ;;  %v1252_v14 = vpop.xlane.xlu1 %1251  ;;  %1461 = vmin.xlane.f32.xlu1 %v2444_v12 }
 0x367   : > { %v2450_v15 = vsel %vm1192_vm2, %v1287_v43, 2147483647  ;;  %vm1272_vm0 = vcmp.eq.f32.partialorder %v2311_v53, %v1252_v14 }
 0x368   : > { %v1288_v17 = vsel %vm1272_vm0, %v2337_v10, 2  ;;  %v1473_v52 = vshra.s32 %v2450_v15, 16 }
 0x369   : > { %v2456_v18 = vsel %vm1192_vm2, %v1288_v17, 2147483647  ;;  %v1429_v17 = vcvt.s32.f32 %v1427_v45 }
 0x36a   : > { %v2458_v20 = vcvt.s32.f32 %v1473_v52  ;;  %v1488_v51 = vshra.s32 %v2456_v18, 16  ;;  %v1487_v60 = vand.u32 65535, %v2456_v18 }
 0x36c   : > { %1476 = vmin.xlane.f32.xlu0 %v2458_v20  ;;  %v1255_v22 = vpop.xlane.xlu0 %1254  ;;  %v2462_v24 = vcvt.s32.f32 %v1488_v51 }
 0x36d   : > { %vm1273_vm1 = vcmp.eq.f32.partialorder %v2321_v5, %v1255_v22 }
 0x36e   : > { %v1289_v53 = vsel %vm1273_vm1, %v2337_v10, 2  ;;  %v1258_v26 = vpop.xlane.xlu1 %1257  ;;  %1491 = vmin.xlane.f32.xlu1 %v2462_v24 }
 0x36f   : > { %v2468_v27 = vsel %vm1192_vm2, %v1289_v53, 2147483647  ;;  %vm1274_vm3 = vcmp.eq.f32.partialorder %v2327_v8, %v1258_v26  ;;  %v1459_v53 = vcvt.s32.f32 %v1457_v63 }
 0x370   : > { %v1290_v28 = vsel %vm1274_vm3, %v2337_v10, 2  ;;  %v1503_v29 = vshra.s32 %v2468_v27, 16  ;;  %v1294_v10 = vcvt.s32.f32 %v1292_v37 }
 0x371   : > { %v2474_v32 = vsel %vm1192_vm2, %v1290_v28, 2147483647 }
 0x372   : > { %v2476_v34 = vcvt.s32.f32 %v1503_v29  ;;  %v1518_v5 = vshra.s32 %v2474_v32, 16  ;;  %v1517_v18 = vand.u32 65535, %v2474_v32 }
 0x374   : > { %1506 = vmin.xlane.f32.xlu0 %v2476_v34  ;;  %v2480_v36 = vcvt.s32.f32 %v1518_v5  ;;  %v1489_v5 = vcvt.s32.f32 %v1487_v60 }
 0x376   : > { %1521 = vmin.xlane.f32.xlu1 %v2480_v36 }
 0x3c9   : > { %v2484_v8 = vpop.xlane.xlu0 %1296 }
 0x3ca   : > { %vm1298_vm2 = vcmp.eq.f32.partialorder %v2347_v16, %v2484_v8 }
 0x3cb   : > { %v1299_v39 = vsel %vm1298_vm2, %v1294_v10, inf  ;;  %vm1531_vm2 = vcmask 7168  }
 0x3cc   : > { %1300 = vmin.xlane.f32.xlu0 %v1299_v39  ;;  %v1519_v39 = vcvt.s32.f32 %v1517_v18 }
 0x3cd   : > { %v2489_v42 = vpop.xlane.xlu1 %1311 }
 0x3ce   : > { %vm1313_vm4 = vcmp.eq.f32.partialorder %v2356_v19, %v2489_v42  ;;  %v1318_v21 = vcvt.f32.s32 %v2489_v42 }
 0x3cf   : > { %v1314_v47 = vsel %vm1313_vm4, %v1309_v44, inf }
 0x3d0   : > { %1315 = vmin.xlane.f32.xlu1 %v1314_v47 }
 0x3d1   : > { %v2494_v59 = vpop.xlane.xlu0 %1326 }
 0x3d2   : > { %vm1328_vm5 = vcmp.eq.f32.partialorder %v2365_v25, %v2494_v59 }
 0x3d3   : > { %v1329_v16 = vsel %vm1328_vm5, %v1324_v23, inf  ;;  %v1319_v23 = vshll.u32 %v1318_v21, 16 }
 0x3d4   : > { %1330 = vmin.xlane.f32.xlu0 %v1329_v16 }
 0x3d5   : > { %v2499_v56 = vpop.xlane.xlu1 %1341 }
 0x3d6   : > { %vm1343_vm6 = vcmp.eq.f32.partialorder %v2374_v30, %v2499_v56  ;;  %v1382_v30 = vand.u32 65535, %v2396_v40  ;;  %v1412_v40 = vand.u32 65535, %v2414_v50  ;;  %v1442_v50 = vand.u32 65535, %v2432_v3 }
 0x3d7   : > { %v1344_v19 = vsel %vm1343_vm6, %v1339_v57, inf  ;;  %v1472_v3 = vand.u32 65535, %v2450_v15  ;;  %v1502_v15 = vand.u32 65535, %v2468_v27  ;;  %v1303_v27 = vcvt.f32.s32 %v2484_v8 }
 0x3d8   : > { %1345 = vmin.xlane.f32.xlu1 %v1344_v19  ;;  %v1384_v7 = vcvt.s32.f32 %v1382_v30  ;;  %v1414_v43 = vcvt.s32.f32 %v1412_v40  ;;  %v1444_v51 = vcvt.s32.f32 %v1442_v50  ;;  %v1333_v8 = vcvt.f32.s32 %v2494_v59 }
 0x3d9   : > { %v2505_v31 = vpop.xlane.xlu0 %1356  ;;  %v1474_v28 = vcvt.s32.f32 %v1472_v3  ;;  %v1504_v10 = vcvt.s32.f32 %v1502_v15  ;;  %v1304_v44 = vshll.u32 %v1303_v27, 16  ;;  %v1348_v54 = vcvt.f32.s32 %v2499_v56 }
 0x3da   : > { %vm1358_vm7 = vcmp.eq.f32.partialorder %v2386_v62, %v2505_v31  ;;  %v1334_v57 = vshll.u32 %v1333_v8, 16 }
 0x3db   : > { %v2509_v25 = vpop.xlane.xlu1 %1371  ;;  %v1359_v61 = vsel %vm1358_vm7, %v1354_v4, inf }
 0x3dc   : > { %1360 = vmin.xlane.f32.xlu0 %v1359_v61  ;;  %vm1373_vm8 = vcmp.eq.f32.partialorder %v2390_v38, %v2509_v25  ;;  %v1349_v61 = vshll.u32 %v1348_v54, 16 }
 0x3dd   : > { %v1374_v6 = vsel %vm1373_vm8, %v1369_v33, inf  ;;  %v1363_v33 = vcvt.f32.s32 %v2505_v31 }
 0x3de   : > { %1375 = vmin.xlane.f32.xlu1 %v1374_v6  ;;  %v1378_v6 = vcvt.f32.s32 %v2509_v25 }
 0x3e1   : > { %v2515_v2 = vpop.xlane.xlu0 %1386 }
 0x3e2   : > { %vm1388_vm9 = vcmp.eq.f32.partialorder %v2404_v46, %v2515_v2  ;;  %v1393_v45 = vcvt.f32.s32 %v2515_v2 }
 0x3e3   : > { %v2519_v62 = vpop.xlane.xlu1 %1401  ;;  %v1389_v9 = vsel %vm1388_vm9, %v1384_v7, inf  ;;  %v1364_v7 = vshll.u32 %v1363_v33, 16 }
 0x3e4   : > { %1390 = vmin.xlane.f32.xlu0 %v1389_v9  ;;  %vm1403_vm10 = vcmp.eq.f32.partialorder %v2408_v48, %v2519_v62 }
 0x3e5   : > { %v1404_v38 = vsel %vm1403_vm10, %v1399_v41, inf  ;;  %v1379_v41 = vshll.u32 %v1378_v6, 16 }
 0x3e6   : > { %1405 = vmin.xlane.f32.xlu1 %v1404_v38 }
 0x3e9   : > { %v2525_v49 = vpop.xlane.xlu0 %1416 }
 0x3ea   : > { %vm1418_vm11 = vcmp.eq.f32.partialorder %v2422_v0, %v2525_v49 }
 0x3eb   : > { %v2529_v46 = vpop.xlane.xlu1 %1431  ;;  %v1419_v14 = vsel %vm1418_vm11, %v1414_v43, inf  ;;  %v1408_v43 = vcvt.f32.s32 %v2519_v62 }
 0x3ec   : > { %1420 = vmin.xlane.f32.xlu0 %v1419_v14  ;;  %vm1433_vm12 = vcmp.eq.f32.partialorder %v2426_v1, %v2529_v46  ;;  %v1394_v14 = vshll.u32 %v1393_v45, 16 }
 0x3ed   : > { %v1434_v48 = vsel %vm1433_vm12, %v1429_v17, inf  ;;  %v1409_v50 = vshll.u32 %v1408_v43, 16 }
 0x3ee   : > { %1435 = vmin.xlane.f32.xlu1 %v1434_v48 }
 0x3f1   : > { %v2535_v52 = vpop.xlane.xlu0 %1446 }
 0x3f2   : > { %vm1448_vm13 = vcmp.eq.f32.partialorder %v2440_v11, %v2535_v52 }
 0x3f3   : > { %v2539_v0 = vpop.xlane.xlu1 %1461  ;;  %v1449_v22 = vsel %vm1448_vm13, %v1444_v51, inf }
 0x3f4   : > { %1450 = vmin.xlane.f32.xlu0 %v1449_v22  ;;  %vm1463_vm14 = vcmp.eq.f32.partialorder %v2444_v12, %v2539_v0  ;;  %v1423_v22 = vcvt.f32.s32 %v2525_v49  ;;  %v1468_v15 = vcvt.f32.s32 %v2539_v0 }
 0x3f5   : > { %v1464_v1 = vsel %vm1463_vm14, %v1459_v53, inf  ;;  %v1438_v53 = vcvt.f32.s32 %v2529_v46 }
 0x3f6   : > { %1465 = vmin.xlane.f32.xlu1 %v1464_v1  ;;  %v1424_v1 = vshll.u32 %v1423_v22, 16 }
 0x3f9   : > { %v2545_v26 = vpop.xlane.xlu0 %1476 }
 0x3fa   : > { %vm1478_vm15 = vcmp.eq.f32.partialorder %v2458_v20, %v2545_v26 }
 0x3fb   : > { %v2549_v11 = vpop.xlane.xlu1 %1491  ;;  %v1479_v29 = vsel %vm1478_vm15, %v1474_v28, inf  ;;  %v1439_v28 = vshll.u32 %v1438_v53, 16 }
 0x3fc   : > { %1480 = vmin.xlane.f32.xlu0 %v1479_v29  ;;  %vm1493_vm0 = vcmp.eq.f32.partialorder %v2462_v24, %v2549_v11 }
 0x3fd   : > { %v1494_v12 = vsel %vm1493_vm0, %v1489_v5, inf }
 0x3fe   : > { %1495 = vmin.xlane.f32.xlu1 %v1494_v12  ;;  %v1453_v12 = vcvt.f32.s32 %v2535_v52 }
 0x400   : > { %v1454_v18 = vshll.u32 %v1453_v12, 16 }
 0x401   : > { %v2555_v37 = vpop.xlane.xlu0 %1506 }
 0x402   : > { %vm1508_vm1 = vcmp.eq.f32.partialorder %v2476_v34, %v2555_v37 }
 0x403   : > { %v2559_v20 = vpop.xlane.xlu1 %1521  ;;  %v1509_v13 = vsel %vm1508_vm1, %v1504_v10, inf }
 0x404   : > { %1510 = vmin.xlane.f32.xlu0 %v1509_v13  ;;  %vm1523_vm3 = vcmp.eq.f32.partialorder %v2480_v36, %v2559_v20 }
 0x405   : > { %v1524_v24 = vsel %vm1523_vm3, %v1519_v39, inf  ;;  %v1469_v39 = vshll.u32 %v1468_v15, 16 }
 0x406   : > { %1525 = vmin.xlane.f32.xlu1 %v1524_v24 }
 0x459   : > { %v1301_v32 = vpop.xlane.xlu0 %1300 }
 0x45a   : > { %v1302_v47 = vcvt.f32.s32 %v1301_v32  ;;  %v1483_v32 = vcvt.f32.s32 %v2545_v26 }
 0x45c   : > { %v1305_v34 = vadd.s32 %v1304_v44, %v1302_v47  ;;  %v1498_v44 = vcvt.f32.s32 %v2549_v11  ;;  %v1484_v21 = vshll.u32 %v1483_v32, 16 }
 0x45d   : > { %v1316_v36 = vpop.xlane.xlu1 %1315 }
 0x45e   : > { %1532 = vst.msk [vmem:[%s2570_s24] sm:$0xff] %vm1531_vm2, %v1305_v34  ;;  %v1317_v58 = vcvt.f32.s32 %v1316_v36  ;;  %v1499_v36 = vshll.u32 %v1498_v44, 16 }
 0x460   : > { %v1320_v42 = vadd.s32 %v1319_v23, %v1317_v58  ;;  %v1513_v58 = vcvt.f32.s32 %v2555_v37 }
 0x461   : > { %v1331_v16 = vpop.xlane.xlu0 %1330 }
 0x462   : > { %1533 = vst.msk [vmem:[%s2570_s24 + $0x8] sm:$0xff] %vm1531_vm2, %v1320_v42  ;;  %v1332_v19 = vcvt.f32.s32 %v1331_v16  ;;  %v1528_v42 = vcvt.f32.s32 %v2559_v20  ;;  %v1514_v16 = vshll.u32 %v1513_v58, 16 }
 0x464   : > { %v1335_v55 = vadd.s32 %v1334_v57, %v1332_v19  ;;  %v1529_v19 = vshll.u32 %v1528_v42, 16 }
 0x465   : > { %v1346_v4 = vpop.xlane.xlu1 %1345 }
 0x466   : > { %1534 = vst.msk [vmem:[%s2570_s24 + $0x10] sm:$0xff] %vm1531_vm2, %v1335_v55  ;;  %v1347_v59 = vcvt.f32.s32 %v1346_v4 }
 0x468   : > { %v1350_v30 = vadd.s32 %v1349_v61, %v1347_v59 }
 0x469   : > { %v1361_v35 = vpop.xlane.xlu0 %1360 }
 0x46a   : > { %1535 = vst.msk [vmem:[%s2570_s24 + $0x18] sm:$0xff] %vm1531_vm2, %v1350_v30  ;;  %v1362_v56 = vcvt.f32.s32 %v1361_v35 }
 0x46b   : > { %v1376_v9 = vpop.xlane.xlu1 %1375 }
 0x46c   : > { %v1365_v38 = vadd.s32 %v1364_v7, %v1362_v56  ;;  %v1377_v40 = vcvt.f32.s32 %v1376_v9 }
 0x46e   : > { %1536 = vst.msk [vmem:[%s2570_s24 + $0x20] sm:$0xff] %vm1531_vm2, %v1365_v38  ;;  %v1380_v31 = vadd.s32 %v1379_v41, %v1377_v40 }
 0x470   : > { %1537 = vst.msk [vmem:[%s2570_s24 + $0x28] sm:$0xff] %vm1531_vm2, %v1380_v31 }
 0x471   : > { %v1391_v25 = vpop.xlane.xlu0 %1390 }
 0x472   : > { %v1392_v17 = vcvt.f32.s32 %v1391_v25 }
 0x473   : > { %v1406_v48 = vpop.xlane.xlu1 %1405 }
 0x474   : > { %v1395_v63 = vadd.s32 %v1394_v14, %v1392_v17  ;;  %v1407_v51 = vcvt.f32.s32 %v1406_v48 }
 0x476   : > { %1538 = vst.msk [vmem:[%s2570_s24 + $0x30] sm:$0xff] %vm1531_vm2, %v1395_v63  ;;  %v1410_v2 = vadd.s32 %v1409_v50, %v1407_v51 }
 0x478   : > { %1539 = vst.msk [vmem:[%s2570_s24 + $0x38] sm:$0xff] %vm1531_vm2, %v1410_v2 }
 0x479   : > { %v1421_v62 = vpop.xlane.xlu0 %1420 }
 0x47a   : > { %v1422_v3 = vcvt.f32.s32 %v1421_v62 }
 0x47b   : > { %v1436_v60 = vpop.xlane.xlu1 %1435 }
 0x47c   : > { %v1425_v29 = vadd.s32 %v1424_v1, %v1422_v3  ;;  %v1437_v5 = vcvt.f32.s32 %v1436_v60 }
 0x47e   : > { %1540 = vst.msk [vmem:[%s2570_s24 + $0x40] sm:$0xff] %vm1531_vm2, %v1425_v29  ;;  %v1440_v49 = vadd.s32 %v1439_v28, %v1437_v5 }
 0x480   : > { %1541 = vst.msk [vmem:[%s2570_s24 + $0x48] sm:$0xff] %vm1531_vm2, %v1440_v49 }
 0x481   : > { %v1451_v46 = vpop.xlane.xlu0 %1450 }
 0x482   : > { %v1452_v10 = vcvt.f32.s32 %v1451_v46 }
 0x483   : > { %v1466_v13 = vpop.xlane.xlu1 %1465 }
 0x484   : > { %v1455_v24 = vadd.s32 %v1454_v18, %v1452_v10  ;;  %v1467_v27 = vcvt.f32.s32 %v1466_v13 }
 0x486   : > { %1542 = vst.msk [vmem:[%s2570_s24 + $0x50] sm:$0xff] %vm1531_vm2, %v1455_v24  ;;  %v1470_v52 = vadd.s32 %v1469_v39, %v1467_v27 }
 0x488   : > { %1543 = vst.msk [vmem:[%s2570_s24 + $0x58] sm:$0xff] %vm1531_vm2, %v1470_v52 }
 0x489   : > { %v1481_v0 = vpop.xlane.xlu0 %1480 }
 0x48a   : > { %v1482_v47 = vcvt.f32.s32 %v1481_v0 }
 0x48b   : > { %v1496_v34 = vpop.xlane.xlu1 %1495 }
 0x48c   : > { %v1485_v23 = vadd.s32 %v1484_v21, %v1482_v47  ;;  %v1497_v8 = vcvt.f32.s32 %v1496_v34 }
 0x48e   : > { %1544 = vst.msk [vmem:[%s2570_s24 + $0x60] sm:$0xff] %vm1531_vm2, %v1485_v23  ;;  %v1500_v26 = vadd.s32 %v1499_v36, %v1497_v8 }
 0x490   : > { %1545 = vst.msk [vmem:[%s2570_s24 + $0x68] sm:$0xff] %vm1531_vm2, %v1500_v26 }
 0x491   : > { %v1511_v11 = vpop.xlane.xlu0 %1510 }
 0x492   : > { %v1512_v57 = vcvt.f32.s32 %v1511_v11 }
 0x493   : > { %v1526_v54 = vpop.xlane.xlu1 %1525 }
 0x494   : > { %v1515_v55 = vadd.s32 %v1514_v16, %v1512_v57  ;;  %v1527_v4 = vcvt.f32.s32 %v1526_v54 }
 0x496   : > { %1546 = vst.msk [vmem:[%s2570_s24 + $0x70] sm:$0xff] %vm1531_vm2, %v1515_v55  ;;  %v1530_v61 = vadd.s32 %v1529_v19, %v1527_v4 }
 0x498   : > { %1547 = vst.msk [vmem:[%s2570_s24 + $0x78] sm:$0xff] %vm1531_vm2, %v1530_v61 }
 0x499 PF: > { %s19_s27 = sadd.s32 1, %s1869_s27  }
 0x49a   : > { %p16_p4 = scmp.ge.s32.totalorder %s19_s27, 4  }
 0x49c   :  { %18 = sbr.rel (!%p16_p4) target bundleno = 1 (0x1), region = 90 }

</bundles_post_ra>
